<compile_context>
chip_gen: v6e
topology: v6e:2x2x1
jax: 0.10.0
libtpu: 0.0.40
codegen_flags: <defaults>
</compile_context>

<pallas_src>
import functools

import jax
import jax.numpy as jnp
from jax.experimental import pallas as pl
from jax.experimental.pallas import tpu as pltpu

_LN_EPS = 1e-5


def _round_up(n, m):
    return (n + m - 1) // m * m


def _largest_divisor(n, cap, align):
    """Largest multiple-of-`align` divisor of `n` that is <= cap (n % align == 0)."""
    for cand in range(cap - cap % align, align - 1, -align):
        if n % cand == 0:
            return cand
    return align


@functools.lru_cache(maxsize=None)
def _vmem_limit():
    """Generation-aware scoped-VMEM limit: ~75% of physical VMEM, capped at 96 MiB
    (64 MiB physical on v7x -> ~48 MiB; 128 MiB on v5e/v6e -> 96 MiB)."""
    try:
        cap = int(pltpu.get_tpu_info().vmem_capacity_bytes)
        return int(min(cap * 3 // 4, 96 * 1024 * 1024))
    except Exception:
        return 48 * 1024 * 1024


# ------------------------- fused LN/linear/GELU/residual kernel -------------------------


def _fused_linear_kernel(*refs, nk, has_bias, has_ln, has_res, activation, eps):
    # ref order: x, [ln_g, ln_b], w, [bias], [residual], out
    idx = 0
    x_ref = refs[idx]; idx += 1
    if has_ln:
        g_ref, b_ln_ref = refs[idx], refs[idx + 1]; idx += 2
    w_ref = refs[idx]; idx += 1
    b_ref = None
    if has_bias:
        b_ref = refs[idx]; idx += 1
    r_ref = None
    if has_res:
        r_ref = refs[idx]; idx += 1
    o_ref = refs[idx]

    x = x_ref[...]                                   # (tm, tk) f32
    if has_ln:                                       # LN fused => tk == Din (full row)
        mu = jnp.mean(x, axis=-1, keepdims=True)
        var = jnp.mean((x - mu) * (x - mu), axis=-1, keepdims=True)
        x = (x - mu) * jax.lax.rsqrt(var + eps) * g_ref[...] + b_ln_ref[...]

    # bf16 inputs on the MXU, f32 accumulation.
    part = jnp.dot(x.astype(w_ref.dtype), w_ref[...],
                   preferred_element_type=jnp.float32)

    def finalize(y):
        if has_bias:
            y = y + b_ref[...]
        if activation == "gelu":
            y = jax.nn.gelu(y)
        if has_res:
            y = y + r_ref[...]
        o_ref[...] = y.astype(o_ref.dtype)

    if nk == 1:
        finalize(part)
    else:
        # accumulate straight into the resident f32 output block (no scratch).
        k = pl.program_id(2)

        @pl.when(k == 0)
        def _():
            o_ref[...] = part

        @pl.when(k > 0)
        def _():
            o_ref[...] += part

        @pl.when(k == nk - 1)
        def _():
            finalize(o_ref[...])


def fused_linear(x, w, b=None, *, ln=None, residual=None, activation=None,
                 tm=256, tn=1024, tk_max=6144):
    """y = [LayerNorm](x) @ w [+ b] [-> gelu] [+ residual].

    x/residual: (N, Din)/(N, Dout) f32 activations, w: (Din, Dout) bf16 (or f32),
    b: (Dout,) f32 or None, ln: (gamma, beta) each (Din,) or None.
    Tiled over rows / output columns / K; K-tiles accumulate into the resident
    output block.  Tile sizes divide the (8-aligned) problem whenever possible
    so padding never exceeds 7 rows and output tiles stay lane-dense.
    """
    N, Din = x.shape
    Dout = w.shape[1]

    # rows: multiple of 8 dividing round_up(N, 8)  -> at most 7 pad rows
    N8 = _round_up(N, 8)
    tm_ = N8 if N8 <= tm else _largest_divisor(N8, tm, 8)
    n_pad = _round_up(N8, tm_)
    # out cols: full dim, or a multiple-of-128 divisor (lane-dense, no masked stores)
    if Dout <= tn:
        tn_ = Dout
    elif Dout % 128 == 0:
        tn_ = _largest_divisor(Dout, tn, 128)
    else:
        tn_ = tn - tn % 128
    # K: LN needs the whole feature row; otherwise only tile very large Din
    if ln is not None or Din <= tk_max:
        tk_ = Din
    elif Din % 128 == 0:
        tk_ = _largest_divisor(Din, tk_max, 128)
    else:
        tk_ = Din
    nk = Din // tk_
    grid = (n_pad // tm_, pl.cdiv(Dout, tn_), nk)

    xp = x.astype(jnp.float32)
    if n_pad != N:
        xp = jnp.pad(xp, ((0, n_pad - N), (0, 0)))

    inputs = [xp]
    in_specs = [pl.BlockSpec((tm_, tk_), lambda i, j, k: (i, k))]
    if ln is not None:
        g, b_ln = ln
        inputs += [g.reshape(1, Din).astype(jnp.float32),
                   b_ln.reshape(1, Din).astype(jnp.float32)]
        in_specs += [pl.BlockSpec((1, Din), lambda i, j, k: (0, 0))] * 2
    inputs.append(w)
    in_specs.append(pl.BlockSpec((tk_, tn_), lambda i, j, k: (k, j)))
    if b is not None:                       # zero-bias path skipped entirely
        inputs.append(b.reshape(1, Dout).astype(jnp.float32))
        in_specs.append(pl.BlockSpec((1, tn_), lambda i, j, k: (0, j)))
    if residual is not None:
        rp = residual.astype(jnp.float32)
        if n_pad != N:
            rp = jnp.pad(rp, ((0, n_pad - N), (0, 0)))
        inputs.append(rp)
        in_specs.append(pl.BlockSpec((tm_, tn_), lambda i, j, k: (i, j)))

    kernel = functools.partial(
        _fused_linear_kernel, nk=nk, has_bias=b is not None,
        has_ln=ln is not None, has_res=residual is not None,
        activation=activation, eps=_LN_EPS)

    out = pl.pallas_call(
        kernel,
        out_shape=jax.ShapeDtypeStruct((n_pad, Dout), jnp.float32),
        grid=grid,
        in_specs=in_specs,
        out_specs=pl.BlockSpec((tm_, tn_), lambda i, j, k: (i, j)),
        compiler_params=pltpu.CompilerParams(
            dimension_semantics=("parallel", "parallel", "arbitrary"),
            vmem_limit_bytes=_vmem_limit()),
    )(*inputs)
    return out if n_pad == N else out[:N]


# ------------------------------- flash multi-head attention -------------------------------


def _flash_attn_kernel(q_ref, k_ref, v_ref, o_ref, m_sc, l_sc, acc_sc,
                       *, tq, ts, s_len, causal, nkv):
    kv_i = pl.program_id(3)

    @pl.when(kv_i == 0)
    def _():
        m_sc[...] = jnp.full(m_sc.shape, -jnp.inf, dtype=m_sc.dtype)
        l_sc[...] = jnp.zeros(l_sc.shape, dtype=l_sc.dtype)
        acc_sc[...] = jnp.zeros(acc_sc.shape, dtype=acc_sc.dtype)

    q_start = pl.program_id(2) * tq
    kv_start = kv_i * ts

    def compute():
        q = q_ref[...]                        # (tq, Dh) bf16, softmax scale pre-folded
        k = k_ref[...]                        # (ts, Dh) bf16
        v = v_ref[...]
        s = jnp.einsum("td,sd->ts", q, k, preferred_element_type=jnp.float32)
        # per-tile 2-D additive mask (causal and/or S-padding), added once
        valid = None
        if causal:
            row = jax.lax.broadcasted_iota(jnp.int32, (tq, ts), 0) + q_start
            col = jax.lax.broadcasted_iota(jnp.int32, (tq, ts), 1) + kv_start
            valid = jnp.logical_and(col < s_len, col <= row)
        elif s_len % ts != 0:
            col = jax.lax.broadcasted_iota(jnp.int32, (tq, ts), 1) + kv_start
            valid = col < s_len
        if valid is not None:
            s = s + jnp.where(valid, 0.0, -1e30)

        m_prev = m_sc[...]
        m_new = jnp.maximum(m_prev, jnp.max(s, axis=-1, keepdims=True))
        alpha = jnp.exp(m_prev - m_new)
        p = jnp.exp(s - m_new)
        l_sc[...] = alpha * l_sc[...] + jnp.sum(p, axis=-1, keepdims=True)
        acc_sc[...] = alpha * acc_sc[...] + jnp.dot(
            p.astype(v.dtype), v, preferred_element_type=jnp.float32)
        m_sc[...] = m_new

    if causal:
        # skip kv tiles that are entirely in the future for this q tile
        pl.when(kv_start <= q_start + tq - 1)(compute)
    else:
        compute()

    @pl.when(kv_i == nkv - 1)
    def _():
        o_ref[...] = (acc_sc[...] * pl.reciprocal(l_sc[...], approx=True)
                      ).astype(o_ref.dtype)


def attention(q, k, v, *, causal, tq_max=256, ts_max=512):
    """q: (B, H, T, Dh), k/v: (B, H, S, Dh) -> (B, H, T, Dh) f32; softmax over S.

    Flash-style: S is tiled with an online softmax so VMEM stays tiny at real
    Whisper sizes (S up to 1500); grid is (B, H, q-tiles, kv-tiles) with the
    first three axes parallel (keeps both v7x TensorCores busy even at B==1).
    q/k/v hit the MXU in bf16, accumulation stays f32.
    """
    B, H, T, Dh = q.shape
    S = k.shape[2]
    # Whisper scales q and k by Dh**-0.25 each; Dh**-0.5 folded into q is equivalent.
    scale = float(Dh) ** -0.5

    T8 = _round_up(T, 8)
    tq = T8 if T8 <= tq_max else _largest_divisor(T8, tq_max, 8)
    S8 = _round_up(S, 8)
    ts = S8 if S8 <= ts_max else _largest_divisor(S8, ts_max, 8)
    Tp, Sp = _round_up(T8, tq), _round_up(S8, ts)

    qb = (q * scale).astype(jnp.bfloat16)
    kb = k.astype(jnp.bfloat16)
    vb = v.astype(jnp.bfloat16)
    if Tp != T:
        qb = jnp.pad(qb, ((0, 0), (0, 0), (0, Tp - T), (0, 0)))
    if Sp != S:
        kb = jnp.pad(kb, ((0, 0), (0, 0), (0, Sp - S), (0, 0)))
        vb = jnp.pad(vb, ((0, 0), (0, 0), (0, Sp - S), (0, 0)))
    nq, nkv = Tp // tq, Sp // ts

    # TODO(synk): pipeline_mode=pl.Buffered(3) on the K/V streams once profiled.
    out = pl.pallas_call(
        functools.partial(_flash_attn_kernel, tq=tq, ts=ts, s_len=S,
                          causal=causal, nkv=nkv),
        out_shape=jax.ShapeDtypeStruct((B, H, Tp, Dh), jnp.float32),
        grid=(B, H, nq, nkv),
        in_specs=[
            pl.BlockSpec((None, None, tq, Dh), lambda b, h, qi, ki: (b, h, qi, 0)),
            pl.BlockSpec((None, None, ts, Dh), lambda b, h, qi, ki: (b, h, ki, 0)),
            pl.BlockSpec((None, None, ts, Dh), lambda b, h, qi, ki: (b, h, ki, 0)),
        ],
        out_specs=pl.BlockSpec((None, None, tq, Dh), lambda b, h, qi, ki: (b, h, qi, 0)),
        scratch_shapes=[pltpu.VMEM((tq, 1), jnp.float32),
                        pltpu.VMEM((tq, 1), jnp.float32),
                        pltpu.VMEM((tq, Dh), jnp.float32)],
        compiler_params=pltpu.CompilerParams(
            dimension_semantics=("parallel", "parallel", "parallel", "arbitrary"),
            vmem_limit_bytes=_vmem_limit()),
    )(qb, kb, vb)
    return out[:, :, :T] if Tp != T else out


# ------------------------------------ decoder glue ------------------------------------


def _split_heads(x, B, L, n_head):
    # (B*L, n_state) -> (B, H, L, Dh)
    dh = x.shape[-1] // n_head
    return x.reshape(B, L, n_head, dh).transpose(0, 2, 1, 3)


def _merge_heads(x, B, L, n_head):
    # (B, H, L, Dh) -> (B*L, n_state)
    dh = x.shape[-1]
    return x.transpose(0, 2, 1, 3).reshape(B * L, n_head * dh)


def openvino_text_decoder_forward(params, x_tokens, xa, kv_cache=None, *,
                                  linear_impl=None, attention_impl=None):
    """Semantics of OpenVINOTextDecoder.forward: returns (logits, kv_cache)."""
    # TODO(synk): incremental self-attention decoding (non-empty self kv_cache ->
    # positional offset + concat with past K/V) is not wired in; this is the
    # first-step path (init_past_inputs with previous_seq_len == 0).  Cross-
    # attention K/V *are* reused from kv_cache when present.
    # TODO(synk): int8 (v5e/v6e) / fp8 (v7x) weight quantization for the
    # decode-dominant weights (logits table, MLP) is not implemented.
    lin = fused_linear if linear_impl is None else linear_impl
    attn = attention if attention_impl is None else attention_impl

    cfg = params["cfg"]
    B, T = x_tokens.shape
    n_state, n_head, vocab = cfg["n_state"], cfg["n_head"], cfg["vocab"]
    bf16 = jnp.bfloat16

    # audio features: (B, n_state, n_audio_ctx) channels-first -> rows (B*S, n_state)
    xa_cl = jnp.transpose(xa, (0, 2, 1)).astype(jnp.float32)
    S = xa_cl.shape[1]
    xa_rows = xa_cl.reshape(B * S, n_state)

    # token + positional embedding (gather is XLA glue)
    h = (jnp.take(params["tok_emb"], x_tokens, axis=0).astype(jnp.float32)
         + params["pos_emb"][:T].astype(jnp.float32))
    h = h.reshape(B * T, n_state)

    out_cache = {}
    for li, blk in enumerate(params["blocks"]):
        # ---- causal self-attention: LN + fused QKV in one kernel ----
        qkv = lin(h, blk["attn_qkv_w"], blk["attn_qkv_b"],
                  ln=(blk["attn_ln_g"], blk["attn_ln_b"]))
        q = qkv[:, :n_state]
        k_self = qkv[:, n_state:2 * n_state]
        v_self = qkv[:, 2 * n_state:]
        # head split/merge transposes carry bf16 (half the HBM bytes)
        o = attn(_split_heads(q.astype(bf16), B, T, n_head),
                 _split_heads(k_self.astype(bf16), B, T, n_head),
                 _split_heads(v_self.astype(bf16), B, T, n_head), causal=True)
        h = lin(_merge_heads(o, B, T, n_head), blk["attn_o_w"], blk["attn_o_b"],
                residual=h)                                  # residual fused
        out_cache[f"k_{li}_self"] = k_self.reshape(B, T, n_state).astype(bf16)
        out_cache[f"v_{li}_self"] = v_self.reshape(B, T, n_state).astype(bf16)

        # ---- cross-attention over audio features ----
        q = lin(h, blk["cross_q_w"], blk["cross_q_b"],
                ln=(blk["cross_ln_g"], blk["cross_ln_b"]))
        ck = kv_cache.get(f"k_{li}_cross") if kv_cache else None
        cv = kv_cache.get(f"v_{li}_cross") if kv_cache else None
        if ck is not None and cv is not None:                # reuse cached cross K/V
            k_cross = jnp.asarray(ck, jnp.float32).reshape(B * S, n_state)
            v_cross = jnp.asarray(cv, jnp.float32).reshape(B * S, n_state)
        else:
            kv = lin(xa_rows, blk["cross_kv_w"], blk["cross_kv_b"])
            k_cross, v_cross = kv[:, :n_state], kv[:, n_state:]
        o = attn(_split_heads(q.astype(bf16), B, T, n_head),
                 _split_heads(k_cross.astype(bf16), B, S, n_head),
                 _split_heads(v_cross.astype(bf16), B, S, n_head), causal=False)
        h = lin(_merge_heads(o, B, T, n_head), blk["cross_o_w"], blk["cross_o_b"],
                residual=h)
        out_cache[f"k_{li}_cross"] = k_cross.reshape(B, S, n_state).astype(bf16)
        out_cache[f"v_{li}_cross"] = v_cross.reshape(B, S, n_state).astype(bf16)

        # ---- MLP: LN + W1 + GELU fused; residual fused into W2 (single K step) ----
        m = lin(h, blk["mlp_w1"], blk["mlp_b1"],
                ln=(blk["mlp_ln_g"], blk["mlp_ln_b"]), activation="gelu")
        h = lin(m, blk["mlp_w2"], blk["mlp_b2"], residual=h)

    # final LayerNorm fused into the tied-embedding logits head; the bf16 table is
    # pre-padded to a 128-multiple vocab and tiled with large lane-dense blocks.
    logits_rows = lin(h, params["tok_emb_t"], None,
                      ln=(params["ln_g"], params["ln_b"]), tn=4096)
    logits_rows = logits_rows[:, :vocab]
    return logits_rows.reshape(B, T, vocab), out_cache


def logits_fn(params, tokens, audio_features):
    """Equivalent of the standalone `logits` helper."""
    return openvino_text_decoder_forward(params, tokens, audio_features, None)[0]


# --------------------------- pure-JAX reference (for checking) ---------------------------


def _ref_linear(x, w, b=None, *, ln=None, residual=None, activation=None, **_):
    x = x.astype(jnp.float32)
    if ln is not None:
        g, b_ln = ln
        mu = jnp.mean(x, axis=-1, keepdims=True)
        var = jnp.mean((x - mu) * (x - mu), axis=-1, keepdims=True)
        x = (x - mu) * jax.lax.rsqrt(var + _LN_EPS) * g + b_ln
    y = jnp.dot(x.astype(w.dtype), w, preferred_element_type=jnp.float32)
    if b is not None:
        y = y + b
    if activation == "gelu":
        y = jax.nn.gelu(y)
    if residual is not None:
        y = y + residual
    return y


def _ref_attention(q, k, v, *, causal, **_):
    # mirrors the kernel's numerics (bf16 operands, f32 softmax/accumulation)
    scale = float(q.shape[-1]) ** -0.5
    qb = (q * scale).astype(jnp.bfloat16)
    kb = k.astype(jnp.bfloat16)
    vb = v.astype(jnp.bfloat16)
    s = jnp.einsum("bhtd,bhsd->bhts", qb, kb, preferred_element_type=jnp.float32)
    if causal:
        T, S = s.shape[-2], s.shape[-1]
        row = jax.lax.broadcasted_iota(jnp.int32, (T, S), 0)
        col = jax.lax.broadcasted_iota(jnp.int32, (T, S), 1)
        s = s + jnp.where(col <= row, 0.0, -1e30)
    p = jax.nn.softmax(s, axis=-1)
    return jnp.einsum("bhts,bhsd->bhtd", p.astype(jnp.bfloat16), vb,
                      preferred_element_type=jnp.float32)


# ------------------------------------ parameter init ------------------------------------


def init_params(key, *, vocab, n_ctx, n_state, n_head, n_layer):
    ks = iter(jax.random.split(key, 8 + 32 * n_layer))
    s = 0.02
    w_dt = jnp.bfloat16   # weights streamed as bf16 (half the HBM bytes, 2x MXU rate)

    def nrm(shape, dtype=jnp.float32):
        return (s * jax.random.normal(next(ks), shape, jnp.float32)).astype(dtype)

    zeros_b = jnp.zeros((n_state,), jnp.float32)

    def attn_weights():
        q_w = nrm((n_state, n_state), w_dt); q_b = nrm((n_state,))
        k_w = nrm((n_state, n_state), w_dt)                         # key proj: no bias
        v_w = nrm((n_state, n_state), w_dt); v_b = nrm((n_state,))
        o_w = nrm((n_state, n_state), w_dt); o_b = nrm((n_state,))
        return q_w, q_b, k_w, v_w, v_b, o_w, o_b

    blocks = []
    for _ in range(n_layer):
        q_w, q_b, k_w, v_w, v_b, o_w, o_b = attn_weights()
        cq_w, cq_b, ck_w, cv_w, cv_b, co_w, co_b = attn_weights()
        blocks.append({
            "attn_ln_g": jnp.ones((n_state,), jnp.float32),
            "attn_ln_b": jnp.zeros((n_state,), jnp.float32),
            # fused QKV; Whisper's key projection has no bias -> zero slice
            "attn_qkv_w": jnp.concatenate([q_w, k_w, v_w], axis=1),
            "attn_qkv_b": jnp.concatenate([q_b, zeros_b, v_b], axis=0),
            "attn_o_w": o_w, "attn_o_b": o_b,
            "cross_ln_g": jnp.ones((n_state,), jnp.float32),
            "cross_ln_b": jnp.zeros((n_state,), jnp.float32),
            "cross_q_w": cq_w, "cross_q_b": cq_b,
            "cross_kv_w": jnp.concatenate([ck_w, cv_w], axis=1),
            "cross_kv_b": jnp.concatenate([zeros_b, cv_b], axis=0),
            "cross_o_w": co_w, "cross_o_b": co_b,
            "mlp_ln_g": jnp.ones((n_state,), jnp.float32),
            "mlp_ln_b": jnp.zeros((n_state,), jnp.float32),
            "mlp_w1": nrm((n_state, 4 * n_state), w_dt), "mlp_b1": nrm((4 * n_state,)),
            "mlp_w2": nrm((4 * n_state, n_state), w_dt), "mlp_b2": nrm((n_state,)),
        })

    tok_emb = nrm((vocab, n_state), w_dt)
    # logits table pre-transposed ONCE and vocab padded to a 128-multiple so the
    # logits head's output tiles are lane-dense (no masked partial stores).
    vocab_pad = _round_up(vocab, 128)
    tok_emb_t = jnp.zeros((n_state, vocab_pad), w_dt).at[:, :vocab].set(tok_emb.T)
    return {
        "cfg": {"vocab": vocab, "n_ctx": n_ctx, "n_state": n_state,
                "n_head": n_head, "n_layer": n_layer},
        "tok_emb": tok_emb,
        "tok_emb_t": tok_emb_t,
        "pos_emb": nrm((n_ctx, n_state)),
        "blocks": blocks,
        "ln_g": jnp.ones((n_state,), jnp.float32),
        "ln_b": jnp.zeros((n_state,), jnp.float32),
    }


# ----------------------------------------- main -----------------------------------------


if __name__ == "__main__":
    B, T = 2, 8
    vocab, n_ctx, n_state, n_head, n_layer = 96, 16, 32, 4, 2
    n_audio_ctx = 16

    root = jax.random.PRNGKey(0)
    k_par, k_tok, k_aud, k_x, k_w, k_b, k_attn = jax.random.split(root, 7)

    params = init_params(k_par, vocab=vocab, n_ctx=n_ctx, n_state=n_state,
                         n_head=n_head, n_layer=n_layer)

    tokens = jax.random.randint(k_tok, (B, T), 0, vocab, dtype=jnp.int32)
    # xa in the PyTorch channels-first convention: (B, n_state, n_audio_ctx)
    xa = jax.random.normal(k_aud, (B, n_state, n_audio_ctx), jnp.float32)

    # 1) K-tiled accumulate-into-output path of the fused linear vs a JAX reference
    xk = jax.random.normal(k_x, (64, 512), jnp.float32)
    wk = (0.1 * jax.random.normal(k_w, (512, 256), jnp.float32)).astype(jnp.bfloat16)
    bk = jax.random.normal(k_b, (256,), jnp.float32)
    y_ktiled = fused_linear(xk, wk, bk, tk_max=128)        # -> nk = 4 K steps
    y_kref = _ref_linear(xk, wk, bk)
    assert float(jnp.max(jnp.abs(y_ktiled - y_kref))) < 5e-2

    # 2) flash attention (multi kv-tile, ragged S padding, causal tile-skip) vs reference
    kq, kk, kv_ = jax.random.split(k_attn, 3)
    qf = jax.random.normal(kq, (1, 2, 20, 16), jnp.float32)
    kf = jax.random.normal(kk, (1, 2, 20, 16), jnp.float32)
    vf = jax.random.normal(kv_, (1, 2, 20, 16), jnp.float32)
    for causal_flag in (False, True):
        o_fl = attention(qf, kf, vf, causal=causal_flag, tq_max=8, ts_max=8)
        o_rf = _ref_attention(qf, kf, vf, causal=causal_flag)
        assert float(jnp.max(jnp.abs(o_fl - o_rf))) < 5e-2

    # 3) full decoder forward (Pallas) vs the pure-JAX reference forward
    out_logits, kv_cache = openvino_text_decoder_forward(params, tokens, xa, None)
    ref_logits, _ = openvino_text_decoder_forward(
        params, tokens, xa, None,
        linear_impl=_ref_linear, attention_impl=_ref_attention)
    jax.block_until_ready((out_logits, kv_cache, ref_logits))

    assert out_logits.shape == (B, T, vocab)
    assert out_logits.dtype == jnp.float32
    assert bool(jnp.all(jnp.isfinite(out_logits)))
    assert float(jnp.max(jnp.abs(out_logits - ref_logits))) < 1e-2
    print("KERNEL_OK")
</pallas_src>

<mosaic_0001>
module attributes {stable_mosaic.version = 11 : i64} {
  func.func @_fused_linear_kernel(%arg0: i32, %arg1: i32, %arg2: i32, %arg3: memref<64x128xf32, #tpu.memory_space<vmem>>, %arg4: memref<128x256xbf16, #tpu.memory_space<vmem>>, %arg5: memref<1x256xf32, #tpu.memory_space<vmem>>, %arg6: memref<64x256xf32, #tpu.memory_space<vmem>>) attributes {dimension_semantics = [#tpu.dimension_semantics<parallel>, #tpu.dimension_semantics<parallel>, #tpu.dimension_semantics<arbitrary>], iteration_bounds = array<i64: 1, 1, 4>, scalar_prefetch = 0 : i64, scratch_operands = 0 : i64, tpu.core_type = #tpu.core_type<tc>, window_params = [{transform_indices = @transform_0, window_bounds = array<i64: 64, 128>}, {transform_indices = @transform_1, window_bounds = array<i64: 128, 256>}, {transform_indices = @transform_2, window_bounds = array<i64: 1, 256>}, {transform_indices = @transform_3, window_bounds = array<i64: 64, 256>}]} {
    %c0 = arith.constant 0 : index
    %c0_0 = arith.constant 0 : index
    %0 = vector.load %arg3[%c0, %c0_0] : memref<64x128xf32, #tpu.memory_space<vmem>>, vector<64x128xf32>
    %1 = arith.truncf %0 : vector<64x128xf32> to vector<64x128xbf16>
    %c0_1 = arith.constant 0 : index
    %c0_2 = arith.constant 0 : index
    %2 = vector.load %arg4[%c0_1, %c0_2] : memref<128x256xbf16, #tpu.memory_space<vmem>>, vector<128x256xbf16>
    %cst = arith.constant dense<0.000000e+00> : vector<64x256xf32>
    %3 = tpu.matmul %1, %2, %cst {dimension_numbers = #tpu.dot_dimension_numbers<[1], [0], [0], [1], [0, 0, 1, 1], [], []>} : vector<64x128xbf16>, vector<128x256xbf16>, vector<64x256xf32> -> vector<64x256xf32>
    %c0_i32 = arith.constant 0 : i32
    %4 = arith.cmpi eq, %arg2, %c0_i32 : i32
    %5 = arith.extui %4 : i1 to i32
    %c0_i32_3 = arith.constant 0 : i32
    %6 = arith.cmpi ne, %5, %c0_i32_3 : i32
    scf.if %6 {
      %c0_7 = arith.constant 0 : index
      %c0_8 = arith.constant 0 : index
      %13 = vector.load %arg6[%c0_7, %c0_8] : memref<64x256xf32, #tpu.memory_space<vmem>>, vector<64x256xf32>
      tpu.vector_store %arg6[%c0_7, %c0_8], %3 {strides = array<i32>} : memref<64x256xf32, #tpu.memory_space<vmem>>, vector<64x256xf32>,
    } else {
    }
    %c0_i32_4 = arith.constant 0 : i32
    %7 = arith.cmpi sgt, %arg2, %c0_i32_4 : i32
    %8 = arith.extui %7 : i1 to i32
    %c0_i32_5 = arith.constant 0 : i32
    %9 = arith.cmpi ne, %8, %c0_i32_5 : i32
    scf.if %9 {
      %c0_7 = arith.constant 0 : index
      %c0_8 = arith.constant 0 : index
      %13 = vector.load %arg6[%c0_7, %c0_8] : memref<64x256xf32, #tpu.memory_space<vmem>>, vector<64x256xf32>
      %14 = arith.addf %13, %3 : vector<64x256xf32>
      %c0_9 = arith.constant 0 : index
      %c0_10 = arith.constant 0 : index
      %15 = vector.load %arg6[%c0_9, %c0_10] : memref<64x256xf32, #tpu.memory_space<vmem>>, vector<64x256xf32>
      tpu.vector_store %arg6[%c0_9, %c0_10], %14 {strides = array<i32>} : memref<64x256xf32, #tpu.memory_space<vmem>>, vector<64x256xf32>,
    } else {
    }
    %c3_i32 = arith.constant 3 : i32
    %10 = arith.cmpi eq, %arg2, %c3_i32 : i32
    %11 = arith.extui %10 : i1 to i32
    %c0_i32_6 = arith.constant 0 : i32
    %12 = arith.cmpi ne, %11, %c0_i32_6 : i32
    scf.if %12 {
      %c0_7 = arith.constant 0 : index
      %c0_8 = arith.constant 0 : index
      %13 = vector.load %arg6[%c0_7, %c0_8] : memref<64x256xf32, #tpu.memory_space<vmem>>, vector<64x256xf32>
      %c0_9 = arith.constant 0 : index
      %c0_10 = arith.constant 0 : index
      %14 = vector.load %arg5[%c0_9, %c0_10] : memref<1x256xf32, #tpu.memory_space<vmem>>, vector<1x256xf32>
      %15 = vector.broadcast %14 : vector<1x256xf32> to vector<64x256xf32>
      %16 = arith.addf %13, %15 : vector<64x256xf32>
      %c0_11 = arith.constant 0 : index
      %c0_12 = arith.constant 0 : index
      %17 = vector.load %arg6[%c0_11, %c0_12] : memref<64x256xf32, #tpu.memory_space<vmem>>, vector<64x256xf32>
      tpu.vector_store %arg6[%c0_11, %c0_12], %16 {strides = array<i32>} : memref<64x256xf32, #tpu.memory_space<vmem>>, vector<64x256xf32>,
    } else {
    }
    return
  }
  func.func @transform_0(%arg0: i32, %arg1: i32, %arg2: i32) -> (i32, i32) {
    %c0_i32 = arith.constant 0 : i32
    return %arg0, %arg2 : i32, i32
  }
  func.func @transform_1(%arg0: i32, %arg1: i32, %arg2: i32) -> (i32, i32) {
    %c0_i32 = arith.constant 0 : i32
    return %arg2, %arg1 : i32, i32
  }
  func.func @transform_2(%arg0: i32, %arg1: i32, %arg2: i32) -> (i32, i32) {
    %c0_i32 = arith.constant 0 : i32
    %c0_i32_0 = arith.constant 0 : i32
    return %c0_i32, %arg1 : i32, i32
  }
  func.func @transform_3(%arg0: i32, %arg1: i32, %arg2: i32) -> (i32, i32) {
    %c0_i32 = arith.constant 0 : i32
    return %arg0, %arg1 : i32, i32
  }
}

</mosaic_0001>

<bundles_post_ra>
// kernel: tpu_custom_call.1
= control target key start
LH: loop header
LB: loop body
LE: loop exit
PB: predicated region body
PF: predicated region fallthrough
CT: control target
= control target key end

     0   :  { %8 = vsyncpa [#allocation3], 0  ;;  %s1222_s0 = inlined_call_operand.hbm [shape: f32[64,512], index: 0, kind: input, shape index: {}]   ;;  %s1223_s1 = inlined_call_operand.hbm [shape: bf16[512,256], index: 1, kind: input, shape index: {}]   ;;  %s1224_s2 = inlined_call_operand.vmem [shape: f32[1,256], index: 2, kind: input, shape index: {}]   ;;  %s1225_s3 = inlined_call_operand.hbm [shape: f32[64,256], index: 3, kind: output, shape index: {}]  }
   0x1   :  { %10 = vsyncpa [#allocation3 + $0x1], 0 }
   0x2   :  { %11 = vsyncpa [#allocation6], 0 }
   0x3   :  { %13 = vsyncpa [#allocation6 + $0x1], 0 }
   0x4   :  { %14 = vsyncpa [#allocation4], 0  ;;  %s1036_s12 = smov 0   ;;  %s1038_s13 = smov 0  }
   0x5   :  { %s1040_s14 = smov 0   ;;  %s1042_s15 = smov 0  }
   0x6   :  { %s1044_s16 = smov 0   ;;  %s1046_s17 = smov 0  }
   0x7 LB: > { %s716_s18 = sadd.s32 4294967295, %s1005_s17   ;;  %s32_s19 = sadd.s32 1, %s1001_s16  ;;  %s1005_s17 = sphi %s1046_s17, %s20_s17   ;;  %s1001_s16 = sphi %s1044_s16, %s1235_s16   ;;  %s997_s15 = sphi %s1042_s15, %s1234_s15   ;;  %s993_s14 = sphi %s1040_s14, %s1233_s14   ;;  %s989_s13 = sphi %s1038_s13, %s1232_s13   ;;  %s985_s12 = sphi %s1036_s12, %s1231_s12  }
   0x8   : > { %p33_p0 = scmp.ge.s32.totalorder %s32_s19, 4  ;;  %s48_s20 = sadd.s32 1, %s993_s14 }
   0x9   : > { %p55_p1 = scmp.ne.s32.totalorder %s993_s14, %s989_s13  ;;  %p56_p2 = scmp.eq.s32.totalorder %s1005_s17, 0 }
   0xa   : > { %s1237_s19 = smov (%p33_p0, %s32_s19), 0  ;;  %p61_p4 = scmp.ne.s32.totalorder %s989_s13, %s985_s12 }
   0xb   : > { %p1072_p3 = por %p56_p2, %p55_p1  ;;  %s44_s22 = ssub.s32 %s1001_s16, %s1237_s19 }
   0xc   : > { %p62_p5 = scmp.eq.s32.totalorder %s716_s18, 0  ;;  %p46_p6 = scmp.eq.s32.totalorder %s44_s22, 0 }
   0xd   : > { %p785_p8 = scmp.lt.s32.totalorder %s1005_s17, 4  ;;  %s1090_s25 = sand.u32 1, %s993_s14  }
   0xe   : > { %p1081_p7 = por %p62_p5, %p61_p4  ;;  %s721_s26 = sshll.u32 %s1001_s16, 7 }
   0xf   : > { %s1087_s24 = scalar_select %p46_p6, %s993_s14, %s48_s20  }
  0x10   : > { %s720_s27 = sshll.u32 %s1090_s25, 6  ;;  %s187_s30 = scalar_lea.hbm %s1222_s0, %s721_s26 }
  0x11   : > { %s179_s4 = scalar_lea.vmem [#allocation2], %s720_s27  ;;  %p1099_p9 = pnand %p785_p8, %p1072_p3 }
  0x12   : > { %s188_s5 = sshll.u32 %s179_s4, 4  ;;  %p726_p10 = scmp.ge.s32.totalorder %s1005_s17, 1  ;;  %s189_s5 = int_to_ptr.vmem [resolvable:$true] %s188_s5 }
  0x13   : > { %s176_s7 = scalar_lea.sflag [#allocation3], %s1090_s25  ;;  %p869_p11 = pneg %p1099_p9 }
  0x14   : > { %s880_s8 = scalar_lea.vmem %s189_s5, 1024  ;;  %s1007_s9 = smov [#allocation2]  }
  0x15   : > { %p881_p12 = scmp.ne.s32.totalorder %s189_s5, %s880_s8  ;;  %s885_s10 = sshll.u32 %s1007_s9, 4  ;;  %s886_s10 = int_to_ptr.vmem [resolvable:$false] %s885_s10 }
  0x16   : > { %s887_s11 = scalar_lea.vmem %s886_s10, 2048  ;;  %p888_p1 = scmp.lt.s32.totalorder %s189_s5, %s886_s10 }
  0x17   : > { %p883_p13 = pnand %p881_p12, %p869_p11  ;;  %p889_p2 = scmp.lt.s32.totalorder %s887_s11, %s880_s8 }
  0x19   : > { %p884_p0 = pneg %p883_p13  ;;  %p890_p3 = por %p889_p2, %p888_p1 }
  0x1b   : > { %p891_p4 = pnand %p890_p3, %p884_p0 }
  0x1d   : > { %894 = shalt.err (!%p891_p4)
}
  0x1e   : > { %s1008_s12 = smov 512   ;;  %s1009_s20 = smov 128  }
  0x1f   : > { %s1010_s21 = smov 8   ;;  %p220_p5 = scmp.lt.s32.totalorder %s1005_s17, 5 }
  0x20   : > { %781 = dma.hbm_to_vmem [thread:$0]  (!%p1099_p9), %s187_s30, 1024, %s189_s5, %s176_s7, %s1008_s12, %s1009_s20, %s1010_s21  }
  0x21   : > { %s722_s22 = sshll.u32 %s1090_s25, 7  ;;  %s753_s26 = sshll.u32 %s1001_s16, 11 }
  0x22   : > { %p1117_p6 = pnand %p726_p10, %p220_p5  ;;  %s211_s4 = scalar_lea.hbm %s1223_s1, %s753_s26 }
  0x23   : > { %s202_s8 = scalar_lea.vmem [#allocation5], %s722_s22  ;;  %s199_s10 = scalar_lea.sflag [#allocation6], %s1090_s25 }
  0x24   : > { %s212_s9 = sshll.u32 %s202_s8, 4  ;;  %s1011_s30 = smov [#allocation5]   ;;  %s213_s9 = int_to_ptr.vmem [resolvable:$true] %s212_s9 }
  0x25   : > { %s908_s11 = scalar_lea.vmem %s213_s9, 2048  ;;  %s913_s5 = sshll.u32 %s1011_s30, 4  ;;  %s914_s5 = int_to_ptr.vmem [resolvable:$false] %s913_s5 }
  0x26   : > { %p909_p8 = scmp.ne.s32.totalorder %s213_s9, %s908_s11  ;;  %s915_s7 = scalar_lea.vmem %s914_s5, 4096 }
  0x27   : > { %p916_p10 = scmp.lt.s32.totalorder %s213_s9, %s914_s5  ;;  %p917_p0 = scmp.lt.s32.totalorder %s915_s7, %s908_s11 }
  0x28   : > { %p911_p12 = pnand %p909_p8, %p869_p11 }
  0x29   : > { %p918_p1 = por %p917_p0, %p916_p10 }
  0x2a   : > { %p912_p13 = pneg %p911_p12 }
  0x2c   : > { %p919_p2 = pnand %p918_p1, %p912_p13 }
  0x2e   : > { %922 = shalt.err (!%p919_p2)
}
  0x2f   : > { %784 = dma.hbm_to_vmem [thread:$0]  (!%p1099_p9), %s211_s4, 2048, %s213_s9, %s199_s10, %s1009_s20, %s1009_s20, %s1010_s21  }
  0x30   : > { %224 = sbr.rel (%p1117_p6) target bundleno = 365 (0x16d), region = 32  ;;  %s226_s25 = sand.u32 (!%p1117_p6), 1, %s989_s13  }
  0x31   : > { %s727_s12 = sshll.u32 (!%p1117_p6), %s226_s25, 6  ;;  %s227_s22 = scalar_lea.sflag (!%p1117_p6), [#allocation3], %s226_s25 }
  0x32   : > { %s1133_s26 = scalar_lea.vmem (!%p1117_p6), [#allocation2], %s727_s12 }
  0x35   : > { %972 = dma.done.wait (%p1081_p7), %s227_s22, 1024  }
  0x36   : > { %974 = vsyncadd (%p1081_p7), %s227_s22, 4294966272  ;;  %s728_s28 = sshll.u32 %s226_s25, 7  ;;  %s236_s29 = scalar_lea.sflag [#allocation6], %s226_s25 }
  0x37   : > { %s1139_s6 = scalar_lea.vmem [#allocation5], %s728_s28 }
  0x38   : > { %976 = dma.done.wait (%p1081_p7), %s236_s29, 2048  }
  0x39   : > { %978 = vsyncadd (%p1081_p7), %s236_s29, 4294965248  ;;  %v1012_v0 = vmov 0   ;;  %v843_v1 = vld [vmem:[%s1139_s6 + $0x74] ss:$8 sps:$4 sm:$0xff]   ;;  %v845_v2 = vld [vmem:[%s1139_s6 + $0x70] ss:$8 sps:$4 sm:$0xff]  }
  0x3a   : > { %417 = vmatprep.mubr.bf16.mxu0 %v1012_v0  ;;  %437 = vmatprep.mubr.bf16.mxu1 %v1012_v0  ;;  %v846_v3 = vld [vmem:[%s1139_s6 + $0x64] ss:$8 sps:$4 sm:$0xff]   ;;  %v848_v4 = vld [vmem:[%s1139_s6 + $0x60] ss:$8 sps:$4 sm:$0xff]   ;;  %v849_v5 = vld [vmem:[%s1139_s6 + $0x54] ss:$8 sps:$4 sm:$0xff]  }
  0x3b   : > { %385 = vmatprep.subr.bf16.mxu0 %v843_v1  ;;  %754 = vmatprep.subr.bf16.mxu1 %v843_v1  ;;  %v851_v6 = vld [vmem:[%s1139_s6 + $0x50] ss:$8 sps:$4 sm:$0xff]   ;;  %v852_v7 = vld [vmem:[%s1139_s6 + $0x44] ss:$8 sps:$4 sm:$0xff]   ;;  %v854_v8 = vld [vmem:[%s1139_s6 + $0x40] ss:$8 sps:$4 sm:$0xff]  }
  0x3c   : > { %386 = vmatpush1.bf16.msra.mxu0 %v845_v2  ;;  %762 = vmatpush1.bf16.msra.mxu1 %v845_v2  ;;  %v855_v9 = vld [vmem:[%s1139_s6 + $0x34] ss:$8 sps:$4 sm:$0xff]   ;;  %v857_v10 = vld [vmem:[%s1139_s6 + $0x30] ss:$8 sps:$4 sm:$0xff]   ;;  %v858_v11 = vld [vmem:[%s1139_s6 + $0x24] ss:$8 sps:$4 sm:$0xff]  }
  0x3d   : > { %387 = vmatprep.subr.bf16.mxu0 %v846_v3  ;;  %755 = vmatprep.subr.bf16.mxu1 %v846_v3  ;;  %v860_v12 = vld [vmem:[%s1139_s6 + $0x20] ss:$8 sps:$4 sm:$0xff]   ;;  %v861_v13 = vld [vmem:[%s1139_s6 + $0x14] ss:$8 sps:$4 sm:$0xff]   ;;  %v863_v14 = vld [vmem:[%s1139_s6 + $0x10] ss:$8 sps:$4 sm:$0xff]  }
  0x3e   : > { %v864_v15 = vld [vmem:[%s1139_s6 + $0x4] ss:$8 sps:$4 sm:$0xff]   ;;  %v866_v16 = vld [vmem:[%s1139_s6] ss:$8 sps:$4 sm:$0xff]   ;;  %v279_v23 = vld [vmem:[%s1133_s26 + $0x10] sm:$0xff]  ;;  %p745_p7 = scmp.ne.s32.totalorder %s997_s15, 0 }
  0x3f   : > { %v277_v17 = vld [vmem:[%s1133_s26] sm:$0xff]  ;;  %v278_v18 = vld [vmem:[%s1133_s26 + $0x8] sm:$0xff]  ;;  %v280_v24 = vld [vmem:[%s1133_s26 + $0x18] sm:$0xff] }
  0x40   : > { %388 = vmatpush1.bf16.msra.mxu0 %v848_v4  ;;  %763 = vmatpush1.bf16.msra.mxu1 %v848_v4  ;;  %v281_v19 = vld [vmem:[%s1133_s26 + $0x20] sm:$0xff]  ;;  %v282_v20 = vld [vmem:[%s1133_s26 + $0x28] sm:$0xff]  ;;  %v285_v21 = vpack.c.bf16 %v278_v18, %v277_v17  ;;  %v283_v25 = vld [vmem:[%s1133_s26 + $0x30] sm:$0xff]  ;;  %v286_v27 = vpack.c.bf16 %v280_v24, %v279_v23 }
  0x41   : > { %389 = vmatprep.subr.bf16.mxu0 %v849_v5  ;;  %756 = vmatprep.subr.bf16.mxu1 %v849_v5  ;;  %v287_v22 = vpack.c.bf16 %v282_v20, %v281_v19  ;;  %v284_v26 = vld [vmem:[%s1133_s26 + $0x38] sm:$0xff] }
  0x42   : > { %v288_v28 = vpack.c.bf16 %v284_v26, %v283_v25 }
  0x44   : > { %390 = vmatpush1.bf16.msra.mxu0 %v851_v6  ;;  %764 = vmatpush1.bf16.msra.mxu1 %v851_v6 }
  0x45   : > { %391 = vmatprep.subr.bf16.mxu0 %v852_v7  ;;  %757 = vmatprep.subr.bf16.mxu1 %v852_v7 }
  0x48   : > { %392 = vmatpush1.bf16.msra.mxu0 %v854_v8  ;;  %765 = vmatpush1.bf16.msra.mxu1 %v854_v8 }
  0x49   : > { %393 = vmatprep.subr.bf16.mxu0 %v855_v9  ;;  %758 = vmatprep.subr.bf16.mxu1 %v855_v9 }
  0x4c   : > { %394 = vmatpush1.bf16.msra.mxu0 %v857_v10  ;;  %766 = vmatpush1.bf16.msra.mxu1 %v857_v10 }
  0x4d   : > { %395 = vmatprep.subr.bf16.mxu0 %v858_v11  ;;  %759 = vmatprep.subr.bf16.mxu1 %v858_v11 }
  0x50   : > { %396 = vmatpush1.bf16.msra.mxu0 %v860_v12  ;;  %767 = vmatpush1.bf16.msra.mxu1 %v860_v12 }
  0x51   : > { %397 = vmatprep.subr.bf16.mxu0 %v861_v13  ;;  %760 = vmatprep.subr.bf16.mxu1 %v861_v13 }
  0x54   : > { %398 = vmatpush1.bf16.msra.mxu0 %v863_v14  ;;  %768 = vmatpush1.bf16.msra.mxu1 %v863_v14 }
  0x55   : > { %399 = vmatprep.subr.bf16.mxu0 %v864_v15  ;;  %761 = vmatprep.subr.bf16.mxu1 %v864_v15 }
  0x58   : > { %400 = vmatpush1.bf16.msra.mxu0 %v866_v16  ;;  %769 = vmatpush1.bf16.msra.mxu1 %v866_v16 }
  0x5b   : > { %418 = vmatmul.mubr.bf16.vlgmr.msra.gmra.mxu0 %v285_v21  ;;  %438 = vmatmul.mubr.bf16.vlgmr.msra.gmra.mxu1 %v287_v22 }
  0x5c   : > { %427 = vmatprep.mubr.bf16.mxu0 %v1012_v0  ;;  %447 = vmatprep.mubr.bf16.mxu1 %v1012_v0 }
  0x63   : > { %428 = vmatmul.mubr.bf16.gmra.mxu0 %v286_v27  ;;  %448 = vmatmul.mubr.bf16.gmra.mxu1 %v288_v28 }
 0x11b   : > { %v419_v29 = vpop.f32.mrf.mxu0  ;;  %v439_v30 = vpop.f32.mrf.mxu1 }
 0x11d   : > { %v421_v31 = vpop.f32.mrf.mxu0  ;;  %v441_v32 = vpop.f32.mrf.mxu1 }
 0x11f   : > { %v423_v33 = vpop.f32.mrf.mxu0  ;;  %v443_v34 = vpop.f32.mrf.mxu1 }
 0x121   : > { %v425_v35 = vpop.f32.mrf.mxu0  ;;  %v445_v36 = vpop.f32.mrf.mxu1 }
 0x123   : > { %v429_v37 = vpop.f32.mrf.mxu0  ;;  %v1169_v38 = vpop.f32.mrf.mxu1 }
 0x125   : > { %v431_v39 = vpop.f32.mrf.mxu0  ;;  %v1171_v40 = vpop.f32.mrf.mxu1  ;;  %461 = sbr.rel (%p745_p7) target bundleno = 306 (0x132), region = 44 }
 0x127   : > { %v433_v41 = vpop.f32.mrf.mxu0  ;;  %v453_v42 = vpop.f32.mrf.mxu1 }
 0x129   : > { %v435_v43 = vpop.f32.mrf.mxu0  ;;  %v1173_v44 = vpop.f32.mrf.mxu1 }
 0x12a   : > { %462 = vst [vmem:[#allocation7] sm:$0xff] %v419_v29  ;;  %463 = vst [vmem:[#allocation7 + $0x8] sm:$0xff] %v421_v31 }
 0x12b   : > { %464 = vst [vmem:[#allocation7 + $0x10] sm:$0xff] %v423_v33  ;;  %465 = vst [vmem:[#allocation7 + $0x18] sm:$0xff] %v425_v35 }
 0x12c   : > { %466 = vst [vmem:[#allocation7 + $0x20] sm:$0xff] %v429_v37  ;;  %467 = vst [vmem:[#allocation7 + $0x28] sm:$0xff] %v431_v39 }
 0x12d   : > { %468 = vst [vmem:[#allocation7 + $0x30] sm:$0xff] %v433_v41  ;;  %469 = vst [vmem:[#allocation7 + $0x38] sm:$0xff] %v435_v43 }
 0x12e   : > { %470 = vst [vmem:[#allocation7 + $0x40] sm:$0xff] %v439_v30  ;;  %471 = vst [vmem:[#allocation7 + $0x48] sm:$0xff] %v441_v32 }
 0x12f   : > { %472 = vst [vmem:[#allocation7 + $0x50] sm:$0xff] %v443_v34  ;;  %473 = vst [vmem:[#allocation7 + $0x58] sm:$0xff] %v445_v36 }
 0x130   : > { %474 = vst [vmem:[#allocation7 + $0x60] sm:$0xff] %v1169_v38  ;;  %475 = vst [vmem:[#allocation7 + $0x68] sm:$0xff] %v1171_v40 }
 0x131   : > { %476 = vst [vmem:[#allocation7 + $0x70] sm:$0xff] %v453_v42  ;;  %477 = vst [vmem:[#allocation7 + $0x78] sm:$0xff] %v1173_v44 }
 0x132 PF: > { %p746_p9 = scmp.le.s32.totalorder %s997_s15, 0 }
 0x134   : > { %481 = sbr.rel (%p746_p9) target bundleno = 324 (0x144), region = 48 }
 0x139   : > { %v482_v45 = vld [vmem:[#allocation7] sm:$0xff]  ;;  %v483_v46 = vld [vmem:[#allocation7 + $0x8] sm:$0xff]  ;;  %v484_v47 = vld [vmem:[#allocation7 + $0x10] sm:$0xff] }
 0x13a   : > { %v498_v48 = vadd.f32 %v482_v45, %v419_v29  ;;  %v499_v49 = vadd.f32 %v483_v46, %v421_v31  ;;  %v500_v50 = vadd.f32 %v484_v47, %v423_v33  ;;  %v485_v51 = vld [vmem:[#allocation7 + $0x18] sm:$0xff]  ;;  %v486_v52 = vld [vmem:[#allocation7 + $0x20] sm:$0xff]  ;;  %v487_v53 = vld [vmem:[#allocation7 + $0x28] sm:$0xff] }
 0x13b   : > { %v501_v54 = vadd.f32 %v485_v51, %v425_v35  ;;  %v502_v55 = vadd.f32 %v486_v52, %v429_v37  ;;  %v503_v56 = vadd.f32 %v487_v53, %v431_v39  ;;  %v488_v57 = vld [vmem:[#allocation7 + $0x30] sm:$0xff]  ;;  %v489_v58 = vld [vmem:[#allocation7 + $0x38] sm:$0xff]  ;;  %v490_v59 = vld [vmem:[#allocation7 + $0x40] sm:$0xff] }
 0x13c   : > { %514 = vst [vmem:[#allocation7] sm:$0xff] %v498_v48  ;;  %515 = vst [vmem:[#allocation7 + $0x8] sm:$0xff] %v499_v49  ;;  %v504_v60 = vadd.f32 %v488_v57, %v433_v41  ;;  %v505_v61 = vadd.f32 %v489_v58, %v435_v43  ;;  %v506_v62 = vadd.f32 %v490_v59, %v439_v30  ;;  %v491_v63 = vld [vmem:[#allocation7 + $0x48] sm:$0xff]  ;;  %v492_v0 = vld [vmem:[#allocation7 + $0x50] sm:$0xff] }
 0x13d   : > { %516 = vst [vmem:[#allocation7 + $0x10] sm:$0xff] %v500_v50  ;;  %v493_v1 = vld [vmem:[#allocation7 + $0x58] sm:$0xff]  ;;  %517 = vst [vmem:[#allocation7 + $0x18] sm:$0xff] %v501_v54  ;;  %v507_v2 = vadd.f32 %v491_v63, %v441_v32  ;;  %v508_v3 = vadd.f32 %v492_v0, %v443_v34  ;;  %v494_v5 = vld [vmem:[#allocation7 + $0x60] sm:$0xff] }
 0x13e   : > { %518 = vst [vmem:[#allocation7 + $0x20] sm:$0xff] %v502_v55  ;;  %519 = vst [vmem:[#allocation7 + $0x28] sm:$0xff] %v503_v56  ;;  %v509_v4 = vadd.f32 %v493_v1, %v445_v36  ;;  %v495_v6 = vld [vmem:[#allocation7 + $0x68] sm:$0xff]  ;;  %v496_v7 = vld [vmem:[#allocation7 + $0x70] sm:$0xff]  ;;  %v510_v8 = vadd.f32 %v494_v5, %v1169_v38 }
 0x13f   : > { %520 = vst [vmem:[#allocation7 + $0x30] sm:$0xff] %v504_v60  ;;  %521 = vst [vmem:[#allocation7 + $0x38] sm:$0xff] %v505_v61  ;;  %v511_v9 = vadd.f32 %v495_v6, %v1171_v40  ;;  %v512_v10 = vadd.f32 %v496_v7, %v453_v42  ;;  %v497_v11 = vld [vmem:[#allocation7 + $0x78] sm:$0xff] }
 0x140   : > { %522 = vst [vmem:[#allocation7 + $0x40] sm:$0xff] %v506_v62  ;;  %523 = vst [vmem:[#allocation7 + $0x48] sm:$0xff] %v507_v2  ;;  %v513_v12 = vadd.f32 %v497_v11, %v1173_v44 }
 0x141   : > { %524 = vst [vmem:[#allocation7 + $0x50] sm:$0xff] %v508_v3  ;;  %525 = vst [vmem:[#allocation7 + $0x58] sm:$0xff] %v509_v4 }
 0x142   : > { %526 = vst [vmem:[#allocation7 + $0x60] sm:$0xff] %v510_v8  ;;  %527 = vst [vmem:[#allocation7 + $0x68] sm:$0xff] %v511_v9 }
 0x143   : > { %528 = vst [vmem:[#allocation7 + $0x70] sm:$0xff] %v512_v10  ;;  %529 = vst [vmem:[#allocation7 + $0x78] sm:$0xff] %v513_v12 }
 0x144 PF: > { %p747_p11 = scmp.ne.s32.totalorder %s997_s15, 3 }
 0x146   : > { %533 = sbr.rel (%p747_p11) target bundleno = 349 (0x15d), region = 52 }
 0x14b   : > { %v552_v13 = vlaneseq  ;;  %v534_v15 = vld [vmem:[#allocation7] sm:$0xff]  ;;  %v535_v18 = vld [vmem:[#allocation7 + $0x8] sm:$0xff]  ;;  %v536_v20 = vld [vmem:[#allocation7 + $0x10] sm:$0xff] }
 0x14c   : > { %v550_v16 = vld [vmem:[%s1224_s2] sm:$0x3]  ;;  %v537_v21 = vld [vmem:[#allocation7 + $0x18] sm:$0xff]  ;;  %v539_v23 = vld [vmem:[#allocation7 + $0x28] sm:$0xff] }
 0x14d   : > { %v553_v14 = vshrl.u32 %v552_v13, 7  ;;  %v538_v22 = vld [vmem:[#allocation7 + $0x20] sm:$0xff]  ;;  %v540_v24 = vld [vmem:[#allocation7 + $0x30] sm:$0xff]  ;;  %v541_v27 = vld [vmem:[#allocation7 + $0x38] sm:$0xff] }
 0x14e   : > { %v542_v28 = vld [vmem:[#allocation7 + $0x40] sm:$0xff]  ;;  %v543_v29 = vld [vmem:[#allocation7 + $0x48] sm:$0xff]  ;;  %v544_v30 = vld [vmem:[#allocation7 + $0x50] sm:$0xff] }
 0x14f   : > { %v554_v17 = vsub.s32 0, %v553_v14  ;;  %v558_v19 = vsub.s32 1, %v553_v14  ;;  %v545_v31 = vld [vmem:[#allocation7 + $0x58] sm:$0xff]  ;;  %v546_v32 = vld [vmem:[#allocation7 + $0x60] sm:$0xff]  ;;  %v547_v37 = vld [vmem:[#allocation7 + $0x68] sm:$0xff] }
 0x150   : > { %v548_v38 = vld [vmem:[#allocation7 + $0x70] sm:$0xff]  ;;  %v549_v39 = vld [vmem:[#allocation7 + $0x78] sm:$0xff] }
 0x151   : > { %v555_v25 = vrot.slane %v550_v16, %v554_v17  ;;  %v559_v26 = vrot.slane %v550_v16, %v558_v19 }
 0x153   : > { %v562_v33 = vadd.f32 %v555_v25, %v534_v15  ;;  %v563_v34 = vadd.f32 %v559_v26, %v535_v18  ;;  %v564_v35 = vadd.f32 %v555_v25, %v536_v20  ;;  %v565_v36 = vadd.f32 %v559_v26, %v537_v21 }
 0x154   : > { %v566_v40 = vadd.f32 %v555_v25, %v538_v22  ;;  %v567_v41 = vadd.f32 %v559_v26, %v539_v23  ;;  %v568_v42 = vadd.f32 %v555_v25, %v540_v24  ;;  %v569_v43 = vadd.f32 %v559_v26, %v541_v27 }
 0x155   : > { %578 = vst [vmem:[#allocation7] sm:$0xff] %v562_v33  ;;  %579 = vst [vmem:[#allocation7 + $0x8] sm:$0xff] %v563_v34  ;;  %v570_v44 = vadd.f32 %v555_v25, %v542_v28  ;;  %v571_v45 = vadd.f32 %v559_v26, %v543_v29  ;;  %v572_v46 = vadd.f32 %v555_v25, %v544_v30 }
 0x156   : > { %580 = vst [vmem:[#allocation7 + $0x10] sm:$0xff] %v564_v35  ;;  %581 = vst [vmem:[#allocation7 + $0x18] sm:$0xff] %v565_v36  ;;  %v573_v47 = vadd.f32 %v559_v26, %v545_v31  ;;  %v574_v48 = vadd.f32 %v555_v25, %v546_v32  ;;  %v575_v49 = vadd.f32 %v559_v26, %v547_v37 }
 0x157   : > { %582 = vst [vmem:[#allocation7 + $0x20] sm:$0xff] %v566_v40  ;;  %583 = vst [vmem:[#allocation7 + $0x28] sm:$0xff] %v567_v41  ;;  %v576_v50 = vadd.f32 %v555_v25, %v548_v38  ;;  %v577_v51 = vadd.f32 %v559_v26, %v549_v39 }
 0x158   : > { %584 = vst [vmem:[#allocation7 + $0x30] sm:$0xff] %v568_v42  ;;  %585 = vst [vmem:[#allocation7 + $0x38] sm:$0xff] %v569_v43 }
 0x159   : > { %586 = vst [vmem:[#allocation7 + $0x40] sm:$0xff] %v570_v44  ;;  %587 = vst [vmem:[#allocation7 + $0x48] sm:$0xff] %v571_v45 }
 0x15a   : > { %588 = vst [vmem:[#allocation7 + $0x50] sm:$0xff] %v572_v46  ;;  %589 = vst [vmem:[#allocation7 + $0x58] sm:$0xff] %v573_v47 }
 0x15b   : > { %590 = vst [vmem:[#allocation7 + $0x60] sm:$0xff] %v574_v48  ;;  %591 = vst [vmem:[#allocation7 + $0x68] sm:$0xff] %v575_v49 }
 0x15c   : > { %592 = vst [vmem:[#allocation7 + $0x70] sm:$0xff] %v576_v50  ;;  %593 = vst [vmem:[#allocation7 + $0x78] sm:$0xff] %v577_v51 }
 0x15d PF: > { %p1189_p3 = scmp.eq.s32.totalorder %s716_s18, 3  ;;  %s1013_s21 = smov [#allocation7]  }
 0x15e   : > { %s606_s27 = sshll.u32 %s1013_s21, 4  ;;  %s607_s27 = int_to_ptr.vmem [resolvable:$true] %s606_s27 }
 0x15f   : > { %s923_s4 = scalar_lea.vmem %s607_s27, 2048  ;;  %p930_p8 = scmp.lt.s32.totalorder %s607_s27, %s607_s27 }
 0x160   : > { %p924_p4 = scmp.ne.s32.totalorder %s607_s27, %s923_s4  ;;  %p931_p12 = scmp.lt.s32.totalorder %s923_s4, %s923_s4 }
 0x162   : > { %p925_p5 = pnand %p924_p4, %p1189_p3  ;;  %p932_p13 = por %p931_p12, %p930_p8 }
 0x164   : > { %p926_p6 = pneg %p925_p5 }
 0x166   : > { %p933_p10 = pnand %p932_p13, %p926_p6 }
 0x168   : > { %936 = shalt.err (!%p933_p10)
}
 0x169   : > { %s1014_s8 = smov 256   ;;  %s1015_s18 = smov 16  }
 0x16a   : > { %775 = dma.vmem_to_hbm [thread:$0]  (%p1189_p3), %s607_s27, 2048, %s1225_s3, [#allocation4], %s1014_s8, %s1014_s8, %s1015_s18  }
 0x16b   : > { %980 = dma.done.wait (%p1189_p3), [#allocation4], 2048  }
 0x16c   : > { %982 = vsyncadd (%p1189_p3), [#allocation4], 4294965248 }
 0x16d PF: > { %s20_s17 = sadd.s32 1, %s1005_s17   ;;  %s1231_s12 = smov %s989_s13 }
 0x16e   : > { %p17_p0 = scmp.ge.s32.totalorder %s20_s17, 6   ;;  %s1232_s13 = smov %s993_s14 }
 0x16f   : > { %s1233_s14 = smov %s1087_s24  ;;  %s1234_s15 = smov %s1001_s16 }
 0x170   : > { %s1235_s16 = smov %s1237_s19  ;;  %19 = sbr.rel (!%p17_p0) target bundleno = 7 (0x7), region = 98 }
 0x175   :  { %622 = vsyncpa [#allocation3], 1 }
 0x176   :  { %624 = vsyncpa [#allocation3 + $0x1], 1 }
 0x177   :  { %625 = vsyncpa [#allocation6], 1 }
 0x178   :  { %627 = vsyncpa [#allocation6 + $0x1], 1 }
 0x179   :  { %628 = vsyncpa [#allocation4], 1 }
 0x17a   :  { %630 = vsyncpa [#allocation4 + $0x1], 1 }

</bundles_post_ra>
